<compile_context>
chip_gen: v6e
topology: v6e:2x2x1
jax: 0.10.0
libtpu: 0.0.40
codegen_flags: <defaults>
</compile_context>

<pallas_src>
import jax
import jax.numpy as jnp
from jax.experimental import pallas as pl
from jax.experimental.pallas import tpu as pltpu

_LANES = 128
_SINGLE_TILE_BYTES = 1 << 20      # per-array padded-VMEM budget for 1-tile path
_TARGET_BLOCK_BYTES = 512 << 10   # per streamed buffer (padded-VMEM estimate)
_MAX_TILE_ROWS = 2048


# ---------------------------------------------------------------------------
# wrapper-side helpers (no data movement: metadata-only reshapes)
# ---------------------------------------------------------------------------
def _as_2d(x):
    """View `x` as 2D without padding or dtype changes."""
    if x.ndim == 0:
        return x.reshape(1, 1)
    if x.ndim == 1:
        return x.reshape(x.shape[0], 1)
    if x.ndim == 2:
        return x
    return x.reshape(x.shape[0], -1)


def _padded_cols(cols):
    return ((cols + _LANES - 1) // _LANES) * _LANES


def _plan(rows, cols, itemsize, tile_rows=None):
    """Pick the grid: returns (num_chunks, tiles_per_chunk, tile_rows, total_tiles)."""
    padded_row_bytes = _padded_cols(cols) * itemsize
    if tile_rows is None:
        if rows * padded_row_bytes <= _SINGLE_TILE_BYTES:
            return 1, 1, rows, 1
        tr = (_TARGET_BLOCK_BYTES // max(1, padded_row_bytes)) // 8 * 8
        tr = int(max(8, min(_MAX_TILE_ROWS, tr)))
    else:
        tr = int(tile_rows)
    if tr >= rows:
        return 1, 1, rows, 1
    tr = max(8, (tr // 8) * 8)      # block sublane dim must be a multiple of 8
    if tr >= rows:
        return 1, 1, rows, 1
    total = -(-rows // tr)          # cdiv
    # v7x megacore: split the row-tile range across two TensorCores when it
    # divides evenly; each chunk writes its own partial, summed in the wrapper.
    nc = 2 if (total % 2 == 0 and total >= 4) else 1
    return nc, total // nc, tr, total


# ---------------------------------------------------------------------------
# in-kernel elementwise math (traced inside the kernel bodies)
# ---------------------------------------------------------------------------
def _score_elem(real, fake):
    # relu(1-r) + relu(1+f) + 0.001*r*r ; summed / n_score == disLoss + 0.001*drift
    return (jnp.maximum(1.0 - real, 0.0) + jnp.maximum(1.0 + fake, 0.0)
            + 0.001 * real * real)


def _hinge_elem(vals):
    logit, label = vals
    sign = label * 2.0 - 1.0
    return jnp.maximum(1.0 - logit * sign, 0.0)


def _bce_nll(logit, label):
    # stable BCE-with-logits: max(x,0) - x*y + log1p(exp(-|x|))
    return (jnp.maximum(logit, 0.0) - logit * label
            + jnp.log1p(jnp.exp(-jnp.abs(logit))))


def _bce_elem(vals):
    rlogit, flogit, label = vals
    return _bce_nll(rlogit, label) + _bce_nll(flogit, label)


def _row_mask(shape, valid_rows):
    return jax.lax.broadcasted_iota(jnp.int32, shape, 0) < valid_rows


# ---------------------------------------------------------------------------
# kernel factories
# ---------------------------------------------------------------------------
def _make_noclass_kernel(*, inv_n_score, rows, tile_rows, tiles_per_chunk,
                         total_tiles, cols):
    ragged = total_tiles > 1 and rows % tile_rows != 0
    valid_last = rows - (total_tiles - 1) * tile_rows

    def kernel(real_ref, fake_ref, out_ref):
        c = pl.program_id(0)
        i = pl.program_id(1)

        @pl.when(i == 0)
        def _init():
            out_ref[0, 0] = 0.0

        def _accum(mask):
            r = real_ref[...].astype(jnp.float32)
            f = fake_ref[...].astype(jnp.float32)
            t = _score_elem(r, f)
            if mask is not None:
                t = jnp.where(mask, t, 0.0)
            out_ref[0, 0] += jnp.sum(t) * inv_n_score

        if ragged:
            is_last = (c * tiles_per_chunk + i) == (total_tiles - 1)

            @pl.when(jnp.logical_not(is_last))
            def _interior():
                _accum(None)

            @pl.when(is_last)
            def _last():
                _accum(_row_mask((tile_rows, cols), valid_last))
        else:
            _accum(None)

    return kernel


def _make_cls_kernel(elem_fn, n_streams, *, inv_n_score, inv_cls_batch, rows,
                     tile_rows, tiles_per_chunk, total_tiles, cols):
    ragged = total_tiles > 1 and rows % tile_rows != 0
    valid_last = rows - (total_tiles - 1) * tile_rows

    def kernel(*refs):
        real_ref, fake_ref = refs[0], refs[1]
        stream_refs = refs[2:2 + n_streams]
        out_ref = refs[2 + n_streams]
        c = pl.program_id(0)
        i = pl.program_id(1)

        @pl.when(i == 0)
        def _init():
            out_ref[0, 0] = 0.0

        # Fold the (disLoss + 0.001*drift) term of the resident score slabs
        # in exactly once: first tile of chunk 0. No mask needed (full arrays).
        @pl.when(jnp.logical_and(c == 0, i == 0))
        def _scores():
            r = real_ref[...].astype(jnp.float32)
            f = fake_ref[...].astype(jnp.float32)
            out_ref[0, 0] += jnp.sum(_score_elem(r, f)) * inv_n_score

        def _accum(mask):
            vals = [s[...].astype(jnp.float32) for s in stream_refs]
            t = elem_fn(vals)
            if mask is not None:
                t = jnp.where(mask, t, 0.0)
            out_ref[0, 0] += jnp.sum(t) * inv_cls_batch

        if ragged:
            is_last = (c * tiles_per_chunk + i) == (total_tiles - 1)

            @pl.when(jnp.logical_not(is_last))
            def _interior():
                _accum(None)

            @pl.when(is_last)
            def _last():
                _accum(_row_mask((tile_rows, cols), valid_last))
        else:
            _accum(None)

    return kernel


# ---------------------------------------------------------------------------
# pallas_call driver
# ---------------------------------------------------------------------------
def _run(kernel, resident, streamed, *, nc, tiles_per_chunk, tile_rows):
    in_specs = (
        [pl.BlockSpec(a.shape, lambda c, i: (0, 0)) for a in resident]
        + [pl.BlockSpec((tile_rows, a.shape[1]),
                        lambda c, i: (c * tiles_per_chunk + i, 0))
           for a in streamed])
    out = pl.pallas_call(
        kernel,
        out_shape=jax.ShapeDtypeStruct((nc, 1), jnp.float32),
        grid_spec=pltpu.PrefetchScalarGridSpec(
            num_scalar_prefetch=0,
            grid=(nc, tiles_per_chunk),
            in_specs=in_specs,
            out_specs=pl.BlockSpec((1, 1), lambda c, i: (c, 0),
                                   memory_space=pltpu.MemorySpace.SMEM)),
        compiler_params=pltpu.CompilerParams(
            dimension_semantics=("parallel", "arbitrary")),
    )(*resident, *streamed)
    # nc partial sums (one per TensorCore chunk); fold them in the wrapper.
    return out[0, 0] if nc == 1 else jnp.sum(out)


# ---------------------------------------------------------------------------
# Python wrapper mirroring DiscriminatorLoss.forward
# ---------------------------------------------------------------------------
def discriminator_loss(realOut, fakeOut, realLogit=None, fakeLogit=None,
                       label=None, lossType='hinge', *,
                       score_tile_rows=None, cls_tile_rows=None):
    real2d = _as_2d(realOut)
    fake2d = _as_2d(fakeOut)
    if real2d.shape != fake2d.shape:
        raise ValueError("realOut and fakeOut must have the same shape")
    n_score = int(real2d.shape[0]) * int(real2d.shape[1])
    inv_n_score = 1.0 / float(n_score)

    if (realLogit is None and fakeLogit is None) or label is None:
        rows, cols = real2d.shape
        itemsize = max(real2d.dtype.itemsize, fake2d.dtype.itemsize)
        nc, tpc, tr, total = _plan(rows, cols, itemsize, score_tile_rows)
        kernel = _make_noclass_kernel(
            inv_n_score=inv_n_score, rows=rows, tile_rows=tr,
            tiles_per_chunk=tpc, total_tiles=total, cols=cols)
        return _run(kernel, resident=[], streamed=[real2d, fake2d],
                    nc=nc, tiles_per_chunk=tpc, tile_rows=tr)

    # classification branches: denominator is the product of the batch dims
    # of the ORIGINAL logit shape (sum(dim=-1).mean()).
    cls_batch = 1
    for d in realLogit.shape[:-1]:
        cls_batch *= int(d)
    inv_cls_batch = 1.0 / float(max(1, cls_batch))

    rlog2d = _as_2d(realLogit)
    lab2d = _as_2d(label)
    if lab2d.shape != rlog2d.shape:
        raise ValueError("label must have the same shape as realLogit")

    if lossType == 'hinge':
        streams = [rlog2d, lab2d]
        elem_fn, n_streams = _hinge_elem, 2
    elif lossType == 'bce':
        flog2d = _as_2d(fakeLogit)
        if flog2d.shape != rlog2d.shape:
            raise ValueError("fakeLogit must have the same shape as realLogit")
        streams = [rlog2d, flog2d, lab2d]
        elem_fn, n_streams = _bce_elem, 3
    else:
        raise ValueError(f"unknown lossType: {lossType!r}")

    rows, cols = rlog2d.shape
    itemsize = max(a.dtype.itemsize for a in streams)
    nc, tpc, tr, total = _plan(rows, cols, itemsize, cls_tile_rows)
    kernel = _make_cls_kernel(
        elem_fn, n_streams, inv_n_score=inv_n_score,
        inv_cls_batch=inv_cls_batch, rows=rows, tile_rows=tr,
        tiles_per_chunk=tpc, total_tiles=total, cols=cols)
    return _run(kernel, resident=[real2d, fake2d], streamed=streams,
                nc=nc, tiles_per_chunk=tpc, tile_rows=tr)


# ---------------------------------------------------------------------------
# Pure-JAX reference (correctness check only)
# ---------------------------------------------------------------------------
def _reference(realOut, fakeOut, realLogit=None, fakeLogit=None, label=None,
               lossType='hinge'):
    r = realOut.astype(jnp.float32)
    f = fakeOut.astype(jnp.float32)
    dis = jnp.mean(jax.nn.relu(1.0 - r) + jax.nn.relu(1.0 + f))
    drift = jnp.mean(r ** 2)
    if (realLogit is None and fakeLogit is None) or label is None:
        return dis + 0.001 * drift

    def hinge_cls(logit, lab):
        c = lab.astype(jnp.float32) * 2.0 - 1.0
        return jnp.mean(jnp.sum(
            jax.nn.relu(1.0 - logit.astype(jnp.float32) * c), axis=-1))

    def bce_cls(logit, lab):
        x = logit.astype(jnp.float32)
        y = lab.astype(jnp.float32)
        nll = -(y * jax.nn.log_sigmoid(x) + (1.0 - y) * jax.nn.log_sigmoid(-x))
        return jnp.mean(jnp.sum(nll, axis=-1))

    if lossType == 'hinge':
        return dis + hinge_cls(realLogit, label) + 0.001 * drift
    if lossType == 'bce':
        return (dis + bce_cls(realLogit, label) + bce_cls(fakeLogit, label)
                + 0.001 * drift)


if __name__ == "__main__":
    key = jax.random.PRNGKey(0)
    ks = jax.random.split(key, 10)

    def check(got, want, name):
        got = jax.block_until_ready(got)
        want = jax.block_until_ready(want)
        assert jnp.allclose(got, want, rtol=1e-5, atol=1e-5), \
            f"{name}: got {got} expected {want}"

    # --- small shapes: single full-array tile path (grid (1,1)) ------------
    B, C = 8, 8
    realOut = jax.random.normal(ks[0], (B, 1), jnp.float32)
    fakeOut = jax.random.normal(ks[1], (B, 1), jnp.float32)
    realLogit = jax.random.normal(ks[2], (B, C), jnp.float32)
    fakeLogit = jax.random.normal(ks[3], (B, C), jnp.float32)
    label = jax.random.bernoulli(ks[4], 0.5, (B, C)).astype(jnp.float32)

    check(discriminator_loss(realOut, fakeOut),
          _reference(realOut, fakeOut), "base")
    check(discriminator_loss(realOut, fakeOut, realLogit, fakeLogit, label,
                             'hinge'),
          _reference(realOut, fakeOut, realLogit, fakeLogit, label, 'hinge'),
          "hinge")
    check(discriminator_loss(realOut, fakeOut, realLogit, fakeLogit, label,
                             'bce'),
          _reference(realOut, fakeOut, realLogit, fakeLogit, label, 'bce'),
          "bce")

    # --- bf16 logits: dtype stays bf16 in HBM, upcast happens in-kernel ----
    rl_bf16 = realLogit.astype(jnp.bfloat16)
    check(discriminator_loss(realOut, fakeOut, rl_bf16, None, label, 'hinge'),
          _reference(realOut, fakeOut, rl_bf16.astype(jnp.float32), None,
                     label, 'hinge'),
          "hinge_bf16")

    # --- streamed path: forced 8-row tiles -> 6 tiles, 2 parallel chunks,
    #     ragged (masked) last tile --------------------------------------
    B2, C2 = 44, 16
    realOut2 = jax.random.normal(ks[5], (B2, 1), jnp.float32)
    fakeOut2 = jax.random.normal(ks[6], (B2, 1), jnp.float32)
    realLogit2 = jax.random.normal(ks[7], (B2, C2), jnp.float32)
    fakeLogit2 = jax.random.normal(ks[8], (B2, C2), jnp.float32)
    label2 = jax.random.bernoulli(ks[9], 0.5, (B2, C2)).astype(jnp.float32)

    check(discriminator_loss(realOut2, fakeOut2, score_tile_rows=8),
          _reference(realOut2, fakeOut2), "base_streamed")
    check(discriminator_loss(realOut2, fakeOut2, realLogit2, fakeLogit2,
                             label2, 'hinge', cls_tile_rows=8),
          _reference(realOut2, fakeOut2, realLogit2, fakeLogit2, label2,
                     'hinge'),
          "hinge_streamed")
    check(discriminator_loss(realOut2, fakeOut2, realLogit2, fakeLogit2,
                             label2, 'bce', cls_tile_rows=8),
          _reference(realOut2, fakeOut2, realLogit2, fakeLogit2, label2,
                     'bce'),
          "bce_streamed")

    print("KERNEL_OK")
</pallas_src>

<mosaic_0001>
module attributes {stable_mosaic.version = 11 : i64} {
  func.func @kernel(%arg0: i32, %arg1: i32, %arg2: memref<8x1xf32, #tpu.memory_space<vmem>>, %arg3: memref<8x1xf32, #tpu.memory_space<vmem>>, %arg4: memref<1x1xf32, #tpu.memory_space<smem>>) attributes {dimension_semantics = [#tpu.dimension_semantics<parallel>, #tpu.dimension_semantics<arbitrary>], iteration_bounds = array<i64: 1, 1>, scalar_prefetch = 0 : i64, scratch_operands = 0 : i64, tpu.core_type = #tpu.core_type<tc>, window_params = [{transform_indices = @transform_0, window_bounds = array<i64: 8, 1>}, {transform_indices = @transform_1, window_bounds = array<i64: 8, 1>}, {transform_indices = @transform_2, window_bounds = array<i64: 1, 1>}]} {
    %c0_i32 = arith.constant 0 : i32
    %0 = arith.cmpi eq, %arg1, %c0_i32 : i32
    %1 = arith.extui %0 : i1 to i32
    %c0_i32_0 = arith.constant 0 : i32
    %2 = arith.cmpi ne, %1, %c0_i32_0 : i32
    scf.if %2 {
      %cst_14 = arith.constant 0.000000e+00 : f32
      %c0_15 = arith.constant 0 : index
      %c0_16 = arith.constant 0 : index
      %26 = memref.load %arg4[%c0_15, %c0_16] : memref<1x1xf32, #tpu.memory_space<smem>>
      memref.store %cst_14, %arg4[%c0_15, %c0_16] : memref<1x1xf32, #tpu.memory_space<smem>>
    } else {
    }
    %c0 = arith.constant 0 : index
    %c0_1 = arith.constant 0 : index
    %3 = vector.load %arg2[%c0, %c0_1] : memref<8x1xf32, #tpu.memory_space<vmem>>, vector<8x1xf32>
    %c0_2 = arith.constant 0 : index
    %c0_3 = arith.constant 0 : index
    %4 = vector.load %arg3[%c0_2, %c0_3] : memref<8x1xf32, #tpu.memory_space<vmem>>, vector<8x1xf32>
    %cst = arith.constant 1.000000e+00 : f32
    %5 = vector.broadcast %cst : f32 to vector<8x1xf32>
    %6 = arith.subf %5, %3 : vector<8x1xf32>
    %cst_4 = arith.constant 0.000000e+00 : f32
    %7 = vector.broadcast %cst_4 : f32 to vector<8x1xf32>
    %8 = arith.maximumf %6, %7 : vector<8x1xf32>
    %cst_5 = arith.constant 1.000000e+00 : f32
    %9 = vector.broadcast %cst_5 : f32 to vector<8x1xf32>
    %10 = arith.addf %9, %4 : vector<8x1xf32>
    %cst_6 = arith.constant 0.000000e+00 : f32
    %11 = vector.broadcast %cst_6 : f32 to vector<8x1xf32>
    %12 = arith.maximumf %10, %11 : vector<8x1xf32>
    %13 = arith.addf %8, %12 : vector<8x1xf32>
    %cst_7 = arith.constant 1.000000e-03 : f32
    %14 = vector.broadcast %cst_7 : f32 to vector<8x1xf32>
    %15 = arith.mulf %14, %3 : vector<8x1xf32>
    %16 = arith.mulf %15, %3 : vector<8x1xf32>
    %17 = arith.addf %13, %16 : vector<8x1xf32>
    %c0_8 = arith.constant 0 : index
    %c0_9 = arith.constant 0 : index
    %18 = memref.load %arg4[%c0_8, %c0_9] : memref<1x1xf32, #tpu.memory_space<smem>>
    %19 = vector.shape_cast %17 : vector<8x1xf32> to vector<1x8x1xf32>
    %cst_10 = arith.constant dense<0.000000e+00> : vector<1xf32>
    %20 = vector.multi_reduction <add>, %19, %cst_10 [1, 2] : vector<1x8x1xf32> to vector<1xf32>
    %21 = vector.shape_cast %20 : vector<1xf32> to vector<1x1x1xf32>
    %22 = vector.extract %21[0, 0, 0] : f32 from vector<1x1x1xf32>
    %cst_11 = arith.constant 1.250000e-01 : f32
    %23 = arith.mulf %22, %cst_11 : f32
    %24 = arith.addf %18, %23 : f32
    %c0_12 = arith.constant 0 : index
    %c0_13 = arith.constant 0 : index
    %25 = memref.load %arg4[%c0_12, %c0_13] : memref<1x1xf32, #tpu.memory_space<smem>>
    memref.store %24, %arg4[%c0_12, %c0_13] : memref<1x1xf32, #tpu.memory_space<smem>>
    return
  }
  func.func @transform_0(%arg0: i32, %arg1: i32) -> (i32, i32) {
    %c1_i32 = arith.constant 1 : i32
    %0 = arith.muli %arg0, %c1_i32 : i32
    %1 = arith.addi %0, %arg1 : i32
    %c0_i32 = arith.constant 0 : i32
    %c0_i32_0 = arith.constant 0 : i32
    return %1, %c0_i32 : i32, i32
  }
  func.func @transform_1(%arg0: i32, %arg1: i32) -> (i32, i32) {
    %c1_i32 = arith.constant 1 : i32
    %0 = arith.muli %arg0, %c1_i32 : i32
    %1 = arith.addi %0, %arg1 : i32
    %c0_i32 = arith.constant 0 : i32
    %c0_i32_0 = arith.constant 0 : i32
    return %1, %c0_i32 : i32, i32
  }
  func.func @transform_2(%arg0: i32, %arg1: i32) -> (i32, i32) {
    %c0_i32 = arith.constant 0 : i32
    %c0_i32_0 = arith.constant 0 : i32
    return %arg0, %c0_i32 : i32, i32
  }
}

</mosaic_0001>

<bundles_post_ra>
// kernel: tpu_custom_call.1
= control target key start
LH: loop header
LB: loop body
LE: loop exit
PB: predicated region body
PF: predicated region fallthrough
CT: control target
= control target key end

     0   :  { %s142_s0 = inlined_call_operand.vmem [shape: f32[8,1], index: 0, kind: input, shape index: {}]   ;;  %s143_s1 = inlined_call_operand.vmem [shape: f32[8,1], index: 1, kind: input, shape index: {}]   ;;  %s144_s2 = inlined_call_operand.hbm [shape: f32[1,1], index: 2, kind: output, shape index: {}]  }
   0x1   :  { %v52_v0 = vld [vmem:[%s142_s0] sm:$0xff] }
   0x2   :  { %v53_v1 = vld [vmem:[%s143_s1] sm:$0xff] }
   0x3   :  { %7 = vsyncpa [#allocation3], 0  ;;  %v54_v2 = vsub.f32 1.0, %v52_v0  ;;  %v56_v3 = vadd.f32 1.0, %v53_v1  ;;  %v59_v4 = vmul.f32 0.001, %v52_v0 }
   0x4   :  { %vm63_vm0 = vcmask 7168   ;;  %s117_s13 = smov [#allocation2]  }
   0x5   :  { %v55_v5 = vmax.f32 %v54_v2, 0.0  ;;  %v57_v6 = vmax.f32 %v56_v3, 0.0  ;;  %v60_v7 = vmul.f32 %v59_v4, %v52_v0 }
   0x7   :  { %v58_v8 = vadd.f32 %v57_v6, %v55_v5 }
   0x9   :  { %v61_v9 = vadd.f32 %v60_v7, %v58_v8 }
   0xb   :  { %v64_v10 = vsel %vm63_vm0, %v61_v9, 0.0 }
   0xc   :  { %65 = vadd.xlane.f32.xlu0 %v64_v10 }
  0x95   :  { %v66_v11 = vpop.xlane.xlu0 %65 }
  0x96   :  { %v67_v12 = vrot.slane %v66_v11, 4 }
  0x98   :  { %v68_v13 = vadd.f32 %v67_v12, %v66_v11 }
  0x9a   :  { %v69_v14 = vrot.slane %v68_v13, 2 }
  0x9c   :  { %v70_v15 = vadd.f32 %v69_v14, %v68_v13 }
  0x9e   :  { %v71_v16 = vrot.slane %v70_v15, 1 }
  0xa0   :  { %v72_v17 = vadd.f32 %v71_v16, %v70_v15 }
  0xa2   :  { %103 = vpush %v72_v17 }
  0xd3   :  { %s104_s0 = spop %103 }
  0xd4   :  { %s74_s1 = smul.f32 0.125, %s104_s0 }
  0xd6   :  { %77 = sst [smem:[#allocation2]] %s74_s1 }
  0xd7   :  { %85 = dma.smem_to_hbm %s117_s13, 16, %s144_s2, [#allocation3]  }
  0xd8   :  { %115 = dma.done.wait [#allocation3], 16  }
  0xd9   :  { %116 = vsyncadd [#allocation3], 4294967280 }
  0xda   :  { %89 = sfence }
  0xdb   :  { %90 = vsyncpa [#allocation3], 1 }

</bundles_post_ra>
